<compile_context>
chip_gen: v7x
topology: tpu7x:2x2x1
jax: 0.10.0
libtpu: 0.0.40
codegen_flags: <defaults>
</compile_context>

<pallas_src>
import jax
import jax.numpy as jnp
from jax import lax
from jax.experimental import pallas as pl
from jax.experimental.pallas import tpu as pltpu


_CHUNK = 8            # query rows per strip (one f32 sublane tile)
_COORD_PAD = 8        # xyz coord axis zero-padded 3 -> 8 for clean MXU shapes
_BIG = 1e30
_CLAMP_MAX = 1e-10    # nn.Hardtanh(min_val=0, max_val=1e-10)
_EPS = 1e-10


def _fp_kernel(xyz1_ref, xyz2t_ref, p1_ref, p2w_ref,
               w0b_ref, s0_ref, b0_ref, w1t_ref, s1_ref, b1_ref,
               out_ref, sel_ref):
    x2t = xyz2t_ref[0]                                   # (8, M)   f32
    m = x2t.shape[1]
    tn = sel_ref.shape[0]
    n_strips = tn // _CHUNK

    # |x2|^2 once per tile (O(M), negligible); loop-invariant, stays in vregs.
    x2sq = jnp.sum(x2t * x2t, axis=0, keepdims=True)     # (1, M)
    col = lax.broadcasted_iota(jnp.int32, (_CHUNK, m), 1)

    def strip_body(i, carry):
        r = pl.multiple_of(i * _CHUNK, _CHUNK)
        x1s = xyz1_ref[0, pl.ds(r, _CHUNK), :]           # (8, 8)  f32
        x1sq = jnp.sum(x1s * x1s, axis=1, keepdims=True) # (8, 1)

        # Pairwise squared distances: cross term on the idle MXU, two
        # broadcast adds on the VPU; clamp at 0 against f32 cancellation.
        cross = jnp.dot(x1s, x2t, preferred_element_type=jnp.float32)
        d2 = jnp.maximum(x1sq + x2sq - 2.0 * cross, 0.0) # (8, M)

        # 3-NN via iterative first-occurrence argmin; the boolean one-hot mask
        # is reused for both the selector update and the knockout.
        dcur = d2
        sel = jnp.zeros((_CHUNK, m), jnp.float32)
        norm = jnp.zeros((_CHUNK, 1), jnp.float32)
        for _ in range(3):
            mn = jnp.min(dcur, axis=-1, keepdims=True)   # (8, 1)
            cand = jnp.where(dcur == mn, col, m)         # first-min index
            amin = jnp.min(cand, axis=-1, keepdims=True)
            mask = col == amin                           # (8, M) bool one-hot
            dc = jnp.clip(mn, 0.0, _CLAMP_MAX)           # Hardtanh(0, 1e-10)
            norm = norm + 1.0 / (dc + _EPS)
            # Module computes 1/dist with no epsilon; guard only against an
            # exact zero so a coincident point stays finite instead of inf.
            inv_d = 1.0 / jnp.maximum(dc, 1e-30)         # (8, 1)
            sel = jnp.where(mask, inv_d, sel)
            dcur = jnp.where(mask, _BIG, dcur)
        inv_norm = 1.0 / (norm + _EPS)                   # (8, 1) exact (tiny)
        sel_ref[pl.ds(r, _CHUNK), :] = sel * inv_norm    # normalized weights
        return carry

    lax.fori_loop(0, n_strips, strip_body, 0)

    # three_interpolate folded with the first 1x1 conv: p2w = points2 @ W0[:C2]
    # was hoisted per batch into the wrapper, so the channel concat reduces to
    # two summed matmuls here.
    h = jnp.dot(sel_ref[...], p2w_ref[0], preferred_element_type=jnp.float32)
    h = h + jnp.dot(p1_ref[0], w0b_ref[...], preferred_element_type=jnp.float32)
    h = jnp.maximum(h * s0_ref[...] + b0_ref[...], 0.0)  # folded BN + ReLU

    # Second conv_bn, produced already transposed off the MXU:
    #   out[o, t] = sum_k W1t[o, k] * h[t, k]            -> (m_last, TN)
    # so the store lane axis is TN (lane-dense) with no XLU transpose.
    h2 = lax.dot_general(w1t_ref[...], h, (((1,), (1,)), ((), ())),
                         preferred_element_type=jnp.float32)
    out_ref[0] = jnp.maximum(h2 * s1_ref[...] + b1_ref[...], 0.0
                             ).astype(out_ref.dtype)


def pointnet_fp_forward(xyz1, xyz2, points1, points2, params, *, tile_n=256):
    """xyz1 (B,N,3), xyz2 (B,M,3), points1 (B,N,C1), points2 (B,M,C2)
    -> (B, mlp[-1], N).  On v7x / v5e consider tile_n=128 (smaller VMEM)."""
    b, n, _ = xyz1.shape
    m = xyz2.shape[1]
    c1 = points1.shape[2]
    c2 = points2.shape[2]
    w0, s0, b0, w1, s1, b1 = params
    mlp0 = w0.shape[1]
    m_last = w1.shape[1]

    # N tiling: the strip loop needs the row count divisible by _CHUNK; tiled
    # case uses 128-aligned tiles.  Padded query rows are sliced off at the end.
    if n <= tile_n:
        tn = ((n + _CHUNK - 1) // _CHUNK) * _CHUNK
        n_pad = tn
    else:
        tn = tile_n
        assert tn % 128 == 0, "tile_n must be a multiple of 128 when tiling N"
        n_pad = ((n + tn - 1) // tn) * tn
    if n_pad != n:
        xyz1 = jnp.pad(xyz1, ((0, 0), (0, n_pad - n), (0, 0)))
        points1 = jnp.pad(points1, ((0, 0), (0, n_pad - n), (0, 0)))
    n_tiles = n_pad // tn

    xyz1 = xyz1.astype(jnp.float32)
    points1 = points1.astype(jnp.float32)
    # Coord axis padded 3 -> 8 (zeros) for clean MXU operand shapes; xyz2 is
    # fed transposed (B, 8, M) so each coordinate row is lane-dense.
    xyz1 = jnp.pad(xyz1, ((0, 0), (0, 0), (0, _COORD_PAD - 3)))
    xyz2_t = jnp.pad(jnp.transpose(xyz2.astype(jnp.float32), (0, 2, 1)),
                     ((0, 0), (0, _COORD_PAD - 3), (0, 0)))        # (B, 8, M)

    # Hoist the per-batch half of the first 1x1 conv out of the N-tile loop.
    w0 = w0.astype(jnp.float32)
    p2w = jnp.einsum('bmc,cd->bmd', points2.astype(jnp.float32), w0[:c2])
    w0_bot = w0[c2:]                                   # (C1, mlp0)
    w1t = jnp.transpose(w1.astype(jnp.float32))        # (m_last, mlp0)
    s0_r = jnp.reshape(s0.astype(jnp.float32), (1, mlp0))
    b0_r = jnp.reshape(b0.astype(jnp.float32), (1, mlp0))
    s1_c = jnp.reshape(s1.astype(jnp.float32), (m_last, 1))
    b1_c = jnp.reshape(b1.astype(jnp.float32), (m_last, 1))

    cost = pl.CostEstimate(
        flops=int(2 * b * n_pad * m * (mlp0 + _COORD_PAD)
                  + 2 * b * n_pad * c1 * mlp0
                  + 2 * b * n_pad * mlp0 * m_last
                  + 20 * b * n_pad * m),
        transcendentals=0,
        bytes_accessed=int(xyz1.size * 4 + xyz2_t.size * 4 + points1.size * 4
                           + p2w.size * 4 + b * n_pad * m_last * 4),
    )

    out = pl.pallas_call(
        _fp_kernel,
        out_shape=jax.ShapeDtypeStruct((b, m_last, n_pad), jnp.float32),
        grid_spec=pltpu.PrefetchScalarGridSpec(
            num_scalar_prefetch=0,
            grid=(b, n_tiles),
            in_specs=[
                pl.BlockSpec((1, tn, _COORD_PAD), lambda bi, ni: (bi, ni, 0)),
                pl.BlockSpec((1, _COORD_PAD, m), lambda bi, ni: (bi, 0, 0)),
                pl.BlockSpec((1, tn, c1), lambda bi, ni: (bi, ni, 0)),
                pl.BlockSpec((1, m, mlp0), lambda bi, ni: (bi, 0, 0)),
                pl.BlockSpec(w0_bot.shape, lambda bi, ni: (0, 0)),
                pl.BlockSpec(s0_r.shape, lambda bi, ni: (0, 0)),
                pl.BlockSpec(b0_r.shape, lambda bi, ni: (0, 0)),
                pl.BlockSpec(w1t.shape, lambda bi, ni: (0, 0)),
                pl.BlockSpec(s1_c.shape, lambda bi, ni: (0, 0)),
                pl.BlockSpec(b1_c.shape, lambda bi, ni: (0, 0)),
            ],
            out_specs=pl.BlockSpec((1, m_last, tn), lambda bi, ni: (bi, 0, ni)),
            scratch_shapes=[pltpu.VMEM((tn, m), jnp.float32)],
        ),
        compiler_params=pltpu.CompilerParams(
            dimension_semantics=("parallel", "parallel")),
        cost_estimate=cost,
    )(xyz1, xyz2_t, points1, p2w,
      w0_bot, s0_r, b0_r, w1t, s1_c, b1_c)

    # Output is already (B, mlp[-1], N_pad); just drop padded query rows.
    return out[:, :, :n] if n_pad != n else out


def fold_conv_bn(key, cin, cout):
    """Deterministic Conv2d(1x1)+BatchNorm2d(eval) folded into (W, scale, bias)."""
    k1, k2, k3, k4, k5, k6 = jax.random.split(key, 6)
    w = jax.random.normal(k1, (cin, cout), jnp.float32) * 0.1   # conv W[:, :, 0, 0].T
    cb = jax.random.normal(k2, (cout,), jnp.float32) * 0.05     # conv bias
    gamma = 1.0 + 0.1 * jax.random.normal(k3, (cout,), jnp.float32)
    beta = 0.05 * jax.random.normal(k4, (cout,), jnp.float32)
    rmean = 0.05 * jax.random.normal(k5, (cout,), jnp.float32)
    rvar = 1.0 + 0.1 * jax.random.uniform(k6, (cout,), jnp.float32)
    eps = 1e-5
    scale = gamma / jnp.sqrt(rvar + eps)
    bias = (cb - rmean) * scale + beta
    return w, scale.reshape(1, cout), bias.reshape(1, cout)


def _reference_forward(xyz1, xyz2, points1, points2, params):
    """Pure-JAX f32 reference mirroring the module's forward semantics."""
    w0, s0, b0, w1, s1, b1 = params
    b, n, _ = xyz1.shape
    m = xyz2.shape[1]
    d2 = jnp.sum((xyz1[:, :, None, :] - xyz2[:, None, :, :]) ** 2, axis=-1)
    col = jnp.arange(m)[None, None, :]
    dcur = d2
    sel = jnp.zeros_like(d2)
    norm = jnp.zeros((b, n, 1), jnp.float32)
    for _ in range(3):
        mn = jnp.min(dcur, axis=-1, keepdims=True)
        cand = jnp.where(dcur == mn, col, m)
        amin = jnp.min(cand, axis=-1, keepdims=True)
        oh = (col == amin)
        dc = jnp.clip(mn, 0.0, _CLAMP_MAX)               # Hardtanh(0, 1e-10)
        norm = norm + 1.0 / (dc + _EPS)
        sel = jnp.where(oh, 1.0 / jnp.maximum(dc, 1e-30), sel)
        dcur = jnp.where(oh, _BIG, dcur)
    weight_sel = sel / (norm + _EPS)
    interp = jnp.einsum('bnm,bmc->bnc', weight_sel, points2)
    feat = jnp.concatenate([interp, points1], axis=-1)
    h = jnp.maximum(jnp.einsum('bnc,cd->bnd', feat, w0) * s0 + b0, 0.0)
    h = jnp.maximum(jnp.einsum('bnc,cd->bnd', h, w1) * s1 + b1, 0.0)
    return jnp.transpose(h, (0, 2, 1))


if __name__ == "__main__":
    key = jax.random.PRNGKey(0)
    kx1, kx2, kp1, kp2, kl0, kl1 = jax.random.split(key, 6)

    B, N, M, C = 2, 16, 8, 4          # batch, dense points, sparse points, feat dim
    mlp = [32, 16]
    dimin = [2 * C, mlp[0]]           # concat(interpolated C, points1 C) = 2C

    xyz1 = jax.random.normal(kx1, (B, N, 3), jnp.float32)
    xyz2 = jax.random.normal(kx2, (B, M, 3), jnp.float32)
    points1 = jax.random.normal(kp1, (B, N, C), jnp.float32)
    points2 = jax.random.normal(kp2, (B, M, C), jnp.float32)

    w0, s0, b0 = fold_conv_bn(kl0, dimin[0], mlp[0])
    w1, s1, b1 = fold_conv_bn(kl1, dimin[1], mlp[1])
    params = (w0, s0, b0, w1, s1, b1)

    out = pointnet_fp_forward(xyz1, xyz2, points1, points2, params)
    jax.block_until_ready(out)
    assert out.shape == (B, mlp[-1], N), out.shape
    assert bool(jnp.all(jnp.isfinite(out)))

    ref = _reference_forward(xyz1, xyz2, points1, points2, params)
    assert bool(jnp.allclose(out, ref, rtol=0.1, atol=0.1)), \
        float(jnp.max(jnp.abs(out - ref)))

    print("KERNEL_OK")
</pallas_src>

<mosaic_0001>
module attributes {stable_mosaic.version = 11 : i64} {
  func.func @_fp_kernel(%arg0: i32, %arg1: i32, %arg2: memref<1x16x8xf32, #tpu.memory_space<vmem>>, %arg3: memref<1x8x8xf32, #tpu.memory_space<vmem>>, %arg4: memref<1x16x4xf32, #tpu.memory_space<vmem>>, %arg5: memref<1x8x32xf32, #tpu.memory_space<vmem>>, %arg6: memref<4x32xf32, #tpu.memory_space<vmem>>, %arg7: memref<1x32xf32, #tpu.memory_space<vmem>>, %arg8: memref<1x32xf32, #tpu.memory_space<vmem>>, %arg9: memref<16x32xf32, #tpu.memory_space<vmem>>, %arg10: memref<16x1xf32, #tpu.memory_space<vmem>>, %arg11: memref<16x1xf32, #tpu.memory_space<vmem>>, %arg12: memref<1x16x16xf32, #tpu.memory_space<vmem>>, %arg13: memref<16x8xf32, #tpu.memory_space<vmem>>) attributes {dimension_semantics = [#tpu.dimension_semantics<parallel>, #tpu.dimension_semantics<parallel>], iteration_bounds = array<i64: 2, 1>, scalar_prefetch = 0 : i64, scratch_operands = 1 : i64, tpu.core_type = #tpu.core_type<tc>, window_params = [{transform_indices = @transform_0, window_bounds = array<i64: 1, 16, 8>}, {transform_indices = @transform_1, window_bounds = array<i64: 1, 8, 8>}, {transform_indices = @transform_2, window_bounds = array<i64: 1, 16, 4>}, {transform_indices = @transform_3, window_bounds = array<i64: 1, 8, 32>}, {pipeline_mode = #tpu.pipeline_mode<synchronous>, transform_indices = @transform_4, window_bounds = array<i64: 4, 32>}, {pipeline_mode = #tpu.pipeline_mode<synchronous>, transform_indices = @transform_5, window_bounds = array<i64: 1, 32>}, {pipeline_mode = #tpu.pipeline_mode<synchronous>, transform_indices = @transform_6, window_bounds = array<i64: 1, 32>}, {pipeline_mode = #tpu.pipeline_mode<synchronous>, transform_indices = @transform_7, window_bounds = array<i64: 16, 32>}, {pipeline_mode = #tpu.pipeline_mode<synchronous>, transform_indices = @transform_8, window_bounds = array<i64: 16, 1>}, {pipeline_mode = #tpu.pipeline_mode<synchronous>, transform_indices = @transform_9, window_bounds = array<i64: 16, 1>}, {transform_indices = @transform_10, window_bounds = array<i64: 1, 16, 16>}]} {
    %c0 = arith.constant 0 : index
    %c0_0 = arith.constant 0 : index
    %c0_1 = arith.constant 0 : index
    %0 = vector.load %arg3[%c0, %c0_0, %c0_1] : memref<1x8x8xf32, #tpu.memory_space<vmem>>, vector<1x8x8xf32>
    %1 = vector.shape_cast %0 : vector<1x8x8xf32> to vector<8x8xf32>
    %2 = arith.mulf %1, %1 : vector<8x8xf32>
    %cst = arith.constant dense<0.000000e+00> : vector<8xf32>
    %3 = vector.multi_reduction <add>, %2, %cst [0] : vector<8x8xf32> to vector<8xf32>
    %4 = vector.shape_cast %3 : vector<8xf32> to vector<1x8xf32>
    %5 = tpu.iota {dimensions = array<i32: 1>} : vector<8x8xi32>
    %c0_i32 = arith.constant 0 : i32
    %c2_i32 = arith.constant 2 : i32
    %6 = arith.addi %c0_i32, %c2_i32 : i32
    %c1_i32 = arith.constant 1 : i32
    scf.for %arg14 = %c0_i32 to %6 step %c1_i32  : i32 {
      %c8_i32 = arith.constant 8 : i32
      %37 = arith.muli %arg14, %c8_i32 : i32
      %38 = tpu.assume_multiple %37, 8 : i32
      %c0_31 = arith.constant 0 : index
      %39 = arith.index_cast %38 : i32 to index
      %c0_32 = arith.constant 0 : index
      %40 = vector.load %arg2[%c0_31, %39, %c0_32] : memref<1x16x8xf32, #tpu.memory_space<vmem>>, vector<1x8x8xf32>
      %41 = vector.shape_cast %40 : vector<1x8x8xf32> to vector<8x8xf32>
      %42 = arith.mulf %41, %41 : vector<8x8xf32>
      %cst_33 = arith.constant dense<0.000000e+00> : vector<8xf32>
      %43 = vector.multi_reduction <add>, %42, %cst_33 [1] : vector<8x8xf32> to vector<8xf32>
      %44 = vector.shape_cast %43 : vector<8xf32> to vector<8x1xf32>
      %cst_34 = arith.constant dense<0.000000e+00> : vector<8x8xf32>
      %45 = tpu.matmul %41, %1, %cst_34 {dimension_numbers = #tpu.dot_dimension_numbers<[1], [0], [0], [1], [0, 0, 1, 1], [], []>} : vector<8x8xf32>, vector<8x8xf32>, vector<8x8xf32> -> vector<8x8xf32>
      %46 = vector.broadcast %44 : vector<8x1xf32> to vector<8x8xf32>
      %47 = vector.broadcast %4 : vector<1x8xf32> to vector<8x8xf32>
      %48 = arith.addf %46, %47 : vector<8x8xf32>
      %cst_35 = arith.constant 2.000000e+00 : f32
      %49 = vector.broadcast %cst_35 : f32 to vector<8x8xf32>
      %50 = arith.mulf %49, %45 : vector<8x8xf32>
      %51 = arith.subf %48, %50 : vector<8x8xf32>
      %cst_36 = arith.constant 0.000000e+00 : f32
      %52 = vector.broadcast %cst_36 : f32 to vector<8x8xf32>
      %53 = arith.maximumf %51, %52 : vector<8x8xf32>
      %cst_37 = arith.constant 0.000000e+00 : f32
      %54 = vector.broadcast %cst_37 : f32 to vector<8x8xf32>
      %cst_38 = arith.constant 0.000000e+00 : f32
      %55 = vector.broadcast %cst_38 : f32 to vector<8x1xf32>
      %cst_39 = arith.constant dense<0x7F800000> : vector<8xf32>
      %56 = vector.multi_reduction <minimumf>, %53, %cst_39 [1] : vector<8x8xf32> to vector<8xf32>
      %57 = vector.shape_cast %56 : vector<8xf32> to vector<8x1xf32>
      %58 = vector.broadcast %57 : vector<8x1xf32> to vector<8x8xf32>
      %59 = arith.cmpf oeq, %53, %58 : vector<8x8xf32>
      %c8_i32_40 = arith.constant 8 : i32
      %60 = vector.broadcast %c8_i32_40 : i32 to vector<8x8xi32>
      %61 = arith.select %59, %5, %60 : vector<8x8xi1>, vector<8x8xi32>
      %cst_41 = arith.constant dense<2147483647> : vector<8xi32>
      %62 = vector.multi_reduction <minsi>, %61, %cst_41 [1] : vector<8x8xi32> to vector<8xi32>
      %63 = vector.shape_cast %62 : vector<8xi32> to vector<8x1xi32>
      %64 = vector.broadcast %63 : vector<8x1xi32> to vector<8x8xi32>
      %65 = arith.cmpi eq, %5, %64 : vector<8x8xi32>
      %cst_42 = arith.constant 0.000000e+00 : f32
      %cst_43 = arith.constant 1.000000e-10 : f32
      %66 = vector.broadcast %cst_42 : f32 to vector<8x1xf32>
      %67 = arith.maximumf %66, %57 : vector<8x1xf32>
      %68 = vector.broadcast %cst_43 : f32 to vector<8x1xf32>
      %69 = arith.minimumf %68, %67 : vector<8x1xf32>
      %cst_44 = arith.constant 1.000000e-10 : f32
      %70 = vector.broadcast %cst_44 : f32 to vector<8x1xf32>
      %71 = arith.addf %69, %70 : vector<8x1xf32>
      %cst_45 = arith.constant 1.000000e+00 : f32
      %72 = vector.broadcast %cst_45 : f32 to vector<8x1xf32>
      %73 = arith.divf %72, %71 : vector<8x1xf32>
      %74 = arith.addf %55, %73 : vector<8x1xf32>
      %cst_46 = arith.constant 1.000000e-30 : f32
      %75 = vector.broadcast %cst_46 : f32 to vector<8x1xf32>
      %76 = arith.maximumf %69, %75 : vector<8x1xf32>
      %cst_47 = arith.constant 1.000000e+00 : f32
      %77 = vector.broadcast %cst_47 : f32 to vector<8x1xf32>
      %78 = arith.divf %77, %76 : vector<8x1xf32>
      %79 = vector.shape_cast %78 : vector<8x1xf32> to vector<8x1xf32>
      %80 = vector.broadcast %79 : vector<8x1xf32> to vector<8x8xf32>
      %81 = arith.select %65, %80, %54 : vector<8x8xi1>, vector<8x8xf32>
      %cst_48 = arith.constant 1.000000e+30 : f32
      %82 = vector.broadcast %cst_48 : f32 to vector<8x8xf32>
      %83 = arith.select %65, %82, %53 : vector<8x8xi1>, vector<8x8xf32>
      %cst_49 = arith.constant dense<0x7F800000> : vector<8xf32>
      %84 = vector.multi_reduction <minimumf>, %83, %cst_49 [1] : vector<8x8xf32> to vector<8xf32>
      %85 = vector.shape_cast %84 : vector<8xf32> to vector<8x1xf32>
      %86 = vector.broadcast %85 : vector<8x1xf32> to vector<8x8xf32>
      %87 = arith.cmpf oeq, %83, %86 : vector<8x8xf32>
      %c8_i32_50 = arith.constant 8 : i32
      %88 = vector.broadcast %c8_i32_50 : i32 to vector<8x8xi32>
      %89 = arith.select %87, %5, %88 : vector<8x8xi1>, vector<8x8xi32>
      %cst_51 = arith.constant dense<2147483647> : vector<8xi32>
      %90 = vector.multi_reduction <minsi>, %89, %cst_51 [1] : vector<8x8xi32> to vector<8xi32>
      %91 = vector.shape_cast %90 : vector<8xi32> to vector<8x1xi32>
      %92 = vector.broadcast %91 : vector<8x1xi32> to vector<8x8xi32>
      %93 = arith.cmpi eq, %5, %92 : vector<8x8xi32>
      %cst_52 = arith.constant 0.000000e+00 : f32
      %cst_53 = arith.constant 1.000000e-10 : f32
      %94 = vector.broadcast %cst_52 : f32 to vector<8x1xf32>
      %95 = arith.maximumf %94, %85 : vector<8x1xf32>
      %96 = vector.broadcast %cst_53 : f32 to vector<8x1xf32>
      %97 = arith.minimumf %96, %95 : vector<8x1xf32>
      %cst_54 = arith.constant 1.000000e-10 : f32
      %98 = vector.broadcast %cst_54 : f32 to vector<8x1xf32>
      %99 = arith.addf %97, %98 : vector<8x1xf32>
      %cst_55 = arith.constant 1.000000e+00 : f32
      %100 = vector.broadcast %cst_55 : f32 to vector<8x1xf32>
      %101 = arith.divf %100, %99 : vector<8x1xf32>
      %102 = arith.addf %74, %101 : vector<8x1xf32>
      %cst_56 = arith.constant 1.000000e-30 : f32
      %103 = vector.broadcast %cst_56 : f32 to vector<8x1xf32>
      %104 = arith.maximumf %97, %103 : vector<8x1xf32>
      %cst_57 = arith.constant 1.000000e+00 : f32
      %105 = vector.broadcast %cst_57 : f32 to vector<8x1xf32>
      %106 = arith.divf %105, %104 : vector<8x1xf32>
      %107 = vector.shape_cast %106 : vector<8x1xf32> to vector<8x1xf32>
      %108 = vector.broadcast %107 : vector<8x1xf32> to vector<8x8xf32>
      %109 = arith.select %93, %108, %81 : vector<8x8xi1>, vector<8x8xf32>
      %cst_58 = arith.constant 1.000000e+30 : f32
      %110 = vector.broadcast %cst_58 : f32 to vector<8x8xf32>
      %111 = arith.select %93, %110, %83 : vector<8x8xi1>, vector<8x8xf32>
      %cst_59 = arith.constant dense<0x7F800000> : vector<8xf32>
      %112 = vector.multi_reduction <minimumf>, %111, %cst_59 [1] : vector<8x8xf32> to vector<8xf32>
      %113 = vector.shape_cast %112 : vector<8xf32> to vector<8x1xf32>
      %114 = vector.broadcast %113 : vector<8x1xf32> to vector<8x8xf32>
      %115 = arith.cmpf oeq, %111, %114 : vector<8x8xf32>
      %c8_i32_60 = arith.constant 8 : i32
      %116 = vector.broadcast %c8_i32_60 : i32 to vector<8x8xi32>
      %117 = arith.select %115, %5, %116 : vector<8x8xi1>, vector<8x8xi32>
      %cst_61 = arith.constant dense<2147483647> : vector<8xi32>
      %118 = vector.multi_reduction <minsi>, %117, %cst_61 [1] : vector<8x8xi32> to vector<8xi32>
      %119 = vector.shape_cast %118 : vector<8xi32> to vector<8x1xi32>
      %120 = vector.broadcast %119 : vector<8x1xi32> to vector<8x8xi32>
      %121 = arith.cmpi eq, %5, %120 : vector<8x8xi32>
      %cst_62 = arith.constant 0.000000e+00 : f32
      %cst_63 = arith.constant 1.000000e-10 : f32
      %122 = vector.broadcast %cst_62 : f32 to vector<8x1xf32>
      %123 = arith.maximumf %122, %113 : vector<8x1xf32>
      %124 = vector.broadcast %cst_63 : f32 to vector<8x1xf32>
      %125 = arith.minimumf %124, %123 : vector<8x1xf32>
      %cst_64 = arith.constant 1.000000e-10 : f32
      %126 = vector.broadcast %cst_64 : f32 to vector<8x1xf32>
      %127 = arith.addf %125, %126 : vector<8x1xf32>
      %cst_65 = arith.constant 1.000000e+00 : f32
      %128 = vector.broadcast %cst_65 : f32 to vector<8x1xf32>
      %129 = arith.divf %128, %127 : vector<8x1xf32>
      %130 = arith.addf %102, %129 : vector<8x1xf32>
      %cst_66 = arith.constant 1.000000e-30 : f32
      %131 = vector.broadcast %cst_66 : f32 to vector<8x1xf32>
      %132 = arith.maximumf %125, %131 : vector<8x1xf32>
      %cst_67 = arith.constant 1.000000e+00 : f32
      %133 = vector.broadcast %cst_67 : f32 to vector<8x1xf32>
      %134 = arith.divf %133, %132 : vector<8x1xf32>
      %135 = vector.shape_cast %134 : vector<8x1xf32> to vector<8x1xf32>
      %136 = vector.broadcast %135 : vector<8x1xf32> to vector<8x8xf32>
      %137 = arith.select %121, %136, %109 : vector<8x8xi1>, vector<8x8xf32>
      %cst_68 = arith.constant 1.000000e-10 : f32
      %138 = vector.broadcast %cst_68 : f32 to vector<8x1xf32>
      %139 = arith.addf %130, %138 : vector<8x1xf32>
      %cst_69 = arith.constant 1.000000e+00 : f32
      %140 = vector.broadcast %cst_69 : f32 to vector<8x1xf32>
      %141 = arith.divf %140, %139 : vector<8x1xf32>
      %142 = vector.broadcast %141 : vector<8x1xf32> to vector<8x8xf32>
      %143 = arith.mulf %137, %142 : vector<8x8xf32>
      %144 = arith.index_cast %38 : i32 to index
      %c0_70 = arith.constant 0 : index
      %145 = vector.load %arg13[%144, %c0_70] : memref<16x8xf32, #tpu.memory_space<vmem>>, vector<8x8xf32>
      tpu.vector_store %arg13[%144, %c0_70], %143 {strides = array<i32>} : memref<16x8xf32, #tpu.memory_space<vmem>>, vector<8x8xf32>,
    }
    %c2_i32_2 = arith.constant 2 : i32
    %c0_3 = arith.constant 0 : index
    %c0_4 = arith.constant 0 : index
    %7 = vector.load %arg13[%c0_3, %c0_4] : memref<16x8xf32, #tpu.memory_space<vmem>>, vector<16x8xf32>
    %c0_5 = arith.constant 0 : index
    %c0_6 = arith.constant 0 : index
    %c0_7 = arith.constant 0 : index
    %8 = vector.load %arg5[%c0_5, %c0_6, %c0_7] : memref<1x8x32xf32, #tpu.memory_space<vmem>>, vector<1x8x32xf32>
    %9 = vector.shape_cast %8 : vector<1x8x32xf32> to vector<8x32xf32>
    %cst_8 = arith.constant dense<0.000000e+00> : vector<16x32xf32>
    %10 = tpu.matmul %7, %9, %cst_8 {dimension_numbers = #tpu.dot_dimension_numbers<[1], [0], [0], [1], [0, 0, 1, 1], [], []>} : vector<16x8xf32>, vector<8x32xf32>, vector<16x32xf32> -> vector<16x32xf32>
    %c0_9 = arith.constant 0 : index
    %c0_10 = arith.constant 0 : index
    %c0_11 = arith.constant 0 : index
    %11 = vector.load %arg4[%c0_9, %c0_10, %c0_11] : memref<1x16x4xf32, #tpu.memory_space<vmem>>, vector<1x16x4xf32>
    %12 = vector.shape_cast %11 : vector<1x16x4xf32> to vector<16x4xf32>
    %c0_12 = arith.constant 0 : index
    %c0_13 = arith.constant 0 : index
    %13 = vector.load %arg6[%c0_12, %c0_13] : memref<4x32xf32, #tpu.memory_space<vmem>>, vector<4x32xf32>
    %cst_14 = arith.constant dense<0.000000e+00> : vector<16x32xf32>
    %14 = tpu.matmul %12, %13, %cst_14 {dimension_numbers = #tpu.dot_dimension_numbers<[1], [0], [0], [1], [0, 0, 1, 1], [], []>} : vector<16x4xf32>, vector<4x32xf32>, vector<16x32xf32> -> vector<16x32xf32>
    %15 = arith.addf %10, %14 : vector<16x32xf32>
    %c0_15 = arith.constant 0 : index
    %c0_16 = arith.constant 0 : index
    %16 = vector.load %arg7[%c0_15, %c0_16] : memref<1x32xf32, #tpu.memory_space<vmem>>, vector<1x32xf32>
    %17 = vector.broadcast %16 : vector<1x32xf32> to vector<16x32xf32>
    %18 = arith.mulf %15, %17 : vector<16x32xf32>
    %c0_17 = arith.constant 0 : index
    %c0_18 = arith.constant 0 : index
    %19 = vector.load %arg8[%c0_17, %c0_18] : memref<1x32xf32, #tpu.memory_space<vmem>>, vector<1x32xf32>
    %20 = vector.broadcast %19 : vector<1x32xf32> to vector<16x32xf32>
    %21 = arith.addf %18, %20 : vector<16x32xf32>
    %cst_19 = arith.constant 0.000000e+00 : f32
    %22 = vector.broadcast %cst_19 : f32 to vector<16x32xf32>
    %23 = arith.maximumf %21, %22 : vector<16x32xf32>
    %c0_20 = arith.constant 0 : index
    %c0_21 = arith.constant 0 : index
    %24 = vector.load %arg9[%c0_20, %c0_21] : memref<16x32xf32, #tpu.memory_space<vmem>>, vector<16x32xf32>
    %cst_22 = arith.constant dense<0.000000e+00> : vector<16x16xf32>
    %25 = tpu.matmul %24, %23, %cst_22 {dimension_numbers = #tpu.dot_dimension_numbers<[1], [1], [0], [0], [0, 0, 1, 0], [], []>} : vector<16x32xf32>, vector<16x32xf32>, vector<16x16xf32> -> vector<16x16xf32>
    %c0_23 = arith.constant 0 : index
    %c0_24 = arith.constant 0 : index
    %26 = vector.load %arg10[%c0_23, %c0_24] : memref<16x1xf32, #tpu.memory_space<vmem>>, vector<16x1xf32>
    %27 = vector.broadcast %26 : vector<16x1xf32> to vector<16x16xf32>
    %28 = arith.mulf %25, %27 : vector<16x16xf32>
    %c0_25 = arith.constant 0 : index
    %c0_26 = arith.constant 0 : index
    %29 = vector.load %arg11[%c0_25, %c0_26] : memref<16x1xf32, #tpu.memory_space<vmem>>, vector<16x1xf32>
    %30 = vector.broadcast %29 : vector<16x1xf32> to vector<16x16xf32>
    %31 = arith.addf %28, %30 : vector<16x16xf32>
    %cst_27 = arith.constant 0.000000e+00 : f32
    %32 = vector.broadcast %cst_27 : f32 to vector<16x16xf32>
    %33 = arith.maximumf %31, %32 : vector<16x16xf32>
    %c0_28 = arith.constant 0 : index
    %c0_29 = arith.constant 0 : index
    %c0_30 = arith.constant 0 : index
    %34 = vector.load %arg12[%c0_28, %c0_29, %c0_30] : memref<1x16x16xf32, #tpu.memory_space<vmem>>, vector<1x16x16xf32>
    %35 = vector.shape_cast %34 : vector<1x16x16xf32> to vector<16x16xf32>
    %36 = vector.shape_cast %33 : vector<16x16xf32> to vector<1x16x16xf32>
    tpu.vector_store %arg12[%c0_28, %c0_29, %c0_30], %36 {strides = array<i32>} : memref<1x16x16xf32, #tpu.memory_space<vmem>>, vector<1x16x16xf32>,
    return
  }
  func.func @transform_0(%arg0: i32, %arg1: i32) -> (i32, i32, i32) {
    %c0_i32 = arith.constant 0 : i32
    %c0_i32_0 = arith.constant 0 : i32
    return %arg0, %arg1, %c0_i32 : i32, i32, i32
  }
  func.func @transform_1(%arg0: i32, %arg1: i32) -> (i32, i32, i32) {
    %c0_i32 = arith.constant 0 : i32
    %c0_i32_0 = arith.constant 0 : i32
    %c0_i32_1 = arith.constant 0 : i32
    return %arg0, %c0_i32, %c0_i32_0 : i32, i32, i32
  }
  func.func @transform_2(%arg0: i32, %arg1: i32) -> (i32, i32, i32) {
    %c0_i32 = arith.constant 0 : i32
    %c0_i32_0 = arith.constant 0 : i32
    return %arg0, %arg1, %c0_i32 : i32, i32, i32
  }
  func.func @transform_3(%arg0: i32, %arg1: i32) -> (i32, i32, i32) {
    %c0_i32 = arith.constant 0 : i32
    %c0_i32_0 = arith.constant 0 : i32
    %c0_i32_1 = arith.constant 0 : i32
    return %arg0, %c0_i32, %c0_i32_0 : i32, i32, i32
  }
  func.func @transform_4(%arg0: i32, %arg1: i32) -> (i32, i32) {
    %c0_i32 = arith.constant 0 : i32
    %c0_i32_0 = arith.constant 0 : i32
    %c0_i32_1 = arith.constant 0 : i32
    return %c0_i32, %c0_i32_0 : i32, i32
  }
  func.func @transform_5(%arg0: i32, %arg1: i32) -> (i32, i32) {
    %c0_i32 = arith.constant 0 : i32
    %c0_i32_0 = arith.constant 0 : i32
    %c0_i32_1 = arith.constant 0 : i32
    return %c0_i32, %c0_i32_0 : i32, i32
  }
  func.func @transform_6(%arg0: i32, %arg1: i32) -> (i32, i32) {
    %c0_i32 = arith.constant 0 : i32
    %c0_i32_0 = arith.constant 0 : i32
    %c0_i32_1 = arith.constant 0 : i32
    return %c0_i32, %c0_i32_0 : i32, i32
  }
  func.func @transform_7(%arg0: i32, %arg1: i32) -> (i32, i32) {
    %c0_i32 = arith.constant 0 : i32
    %c0_i32_0 = arith.constant 0 : i32
    %c0_i32_1 = arith.constant 0 : i32
    return %c0_i32, %c0_i32_0 : i32, i32
  }
  func.func @transform_8(%arg0: i32, %arg1: i32) -> (i32, i32) {
    %c0_i32 = arith.constant 0 : i32
    %c0_i32_0 = arith.constant 0 : i32
    %c0_i32_1 = arith.constant 0 : i32
    return %c0_i32, %c0_i32_0 : i32, i32
  }
  func.func @transform_9(%arg0: i32, %arg1: i32) -> (i32, i32) {
    %c0_i32 = arith.constant 0 : i32
    %c0_i32_0 = arith.constant 0 : i32
    %c0_i32_1 = arith.constant 0 : i32
    return %c0_i32, %c0_i32_0 : i32, i32
  }
  func.func @transform_10(%arg0: i32, %arg1: i32) -> (i32, i32, i32) {
    %c0_i32 = arith.constant 0 : i32
    %c0_i32_0 = arith.constant 0 : i32
    return %arg0, %c0_i32, %arg1 : i32, i32, i32
  }
}

</mosaic_0001>

<bundles_post_ra>
// kernel: tpu_custom_call.1
= control target key start
LH: loop header
LB: loop body
LE: loop exit
PB: predicated region body
PF: predicated region fallthrough
CT: control target
= control target key end

     0   :  { %15 = vsyncpa [#allocation4], 0  ;;  %s1648_s0 = inlined_call_operand.vmem [shape: f32[2,16,8], index: 0, kind: input, shape index: {}]   ;;  %s1649_s1 = inlined_call_operand.vmem [shape: f32[2,8,8], index: 1, kind: input, shape index: {}]   ;;  %s1650_s2 = inlined_call_operand.vmem [shape: f32[2,16,4], index: 2, kind: input, shape index: {}]   ;;  %s1651_s3 = inlined_call_operand.vmem [shape: f32[2,8,32], index: 3, kind: input, shape index: {}]   ;;  %s1652_s4 = inlined_call_operand.vmem [shape: f32[4,32], index: 4, kind: input, shape index: {}]   ;;  %s1653_s5 = inlined_call_operand.vmem [shape: f32[1,32], index: 5, kind: input, shape index: {}]   ;;  %s1654_s6 = inlined_call_operand.vmem [shape: f32[1,32], index: 6, kind: input, shape index: {}]   ;;  %s1655_s7 = inlined_call_operand.vmem [shape: f32[16,32], index: 7, kind: input, shape index: {}]   ;;  %s1656_s8 = inlined_call_operand.vmem [shape: f32[16,1], index: 8, kind: input, shape index: {}]   ;;  %s1657_s9 = inlined_call_operand.vmem [shape: f32[16,1], index: 9, kind: input, shape index: {}]   ;;  %s1658_s10 = inlined_call_operand.hbm [shape: f32[2,16,16], index: 10, kind: output, shape index: {}]  }
   0x1   :  { %17 = vsyncpa [#allocation4 + $0x1], 0  ;;  %s1429_s13 = smov 0   ;;  %s1431_s14 = smov 0  }
   0x2   :  { %s1433_s15 = smov 0   ;;  %s1435_s16 = smov 0  }
   0x3   :  { %s1437_s17 = smov 0   ;;  %s1439_s18 = smov 0  }
   0x4 LB: > { %1665 = sst [smem:[#allocation6_spill]] %s1342_s13  ;;  %s1121_s19 = sadd.s32 4294967295, %s1362_s18   ;;  %s1362_s18 = sphi %s1439_s18, %s23_s18   ;;  %s1358_s17 = sphi %s1437_s17, %s1679_s17   ;;  %s1354_s16 = sphi %s1435_s16, %s1678_s16   ;;  %s1350_s15 = sphi %s1433_s15, %s1677_s15   ;;  %s1346_s14 = sphi %s1431_s14, %s1681_s14   ;;  %s1342_s13 = sphi %s1429_s13, %s1680_s13  }
   0x5   : > { %1666 = sst [smem:[#allocation7_spill]] %s1350_s15  ;;  %s1122_s20 = sadd.s32 4294967294, %s1362_s18  }
   0x6   : > { %1667 = sst [smem:[#allocation8_spill]] %s1358_s17  ;;  %s35_s21 = sadd.s32 1, %s1358_s17 }
   0x7   : > { %s278_s22 = sadd.s32 1, %s1350_s15  ;;  %p37_p0 = scmp.ge.s32.totalorder %s35_s21, 2 }
   0x8   : > { %p288_p1 = scmp.ne.s32.totalorder %s1350_s15, %s1346_s14  ;;  %p289_p2 = scmp.eq.s32.totalorder %s1121_s19, 1 }
   0x9   : > { %p294_p3 = scmp.ne.s32.totalorder %s1346_s14, %s1342_s13  ;;  %s1683_s21 = smov (%p37_p0, %s35_s21), 0 }
   0xa   : > { %1668 = sst [smem:[#allocation9_spill]] %s1683_s21  ;;  %p1469_p4 = por %p289_p2, %p288_p1 }
   0xb   : > { %p295_p5 = scmp.eq.s32.totalorder %s1122_s20, 1  ;;  %s273_s24 = ssub.s32 %s1358_s17, %s1683_s21 }
   0xc   : > { %p1125_p6 = scmp.ge.s32.totalorder %s1362_s18, 1  ;;  %p276_p7 = scmp.eq.s32.totalorder %s273_s24, 0 }
   0xd   : > { %p1476_p8 = por %p295_p5, %p294_p3  ;;  %p371_p9 = scmp.lt.s32.totalorder %s1362_s18, 3 }
   0xe   : > { %s1482_s26 = scalar_select %p276_p7, %s1350_s15, %s278_s22  }
   0xf   : > { %s1670_s25 = scalar_select %p1476_p8, 1, 0 }
  0x10   : > { %1672 = sst [smem:[#allocation11_spill]] %s1482_s26  ;;  %p372_p10 = pnand %p1125_p6, %p371_p9 }
  0x11   : > { %1671 = sst [smem:[#allocation10_spill]] %s1670_s25  ;;  %s1662_s27 = sand.u32 (!%p372_p10), 1, %s1346_s14   ;;  %v468_v0 = vlaneseq (!%p372_p10)  ;;  %vm460_vm0 = vcmask (!%p372_p10), 64512  }
  0x12   : > { %375 = sbr.rel (%p372_p10) target bundleno = 2065 (0x811), region = 60  ;;  %p431_p11 = scmp.lt.s32.totalorder (!%p372_p10), %s1354_s16, 1 }
  0x13   : > { %s1126_s28 = sshll.u32 (!%p372_p10), %s1662_s27, 4  ;;  %v1488_v1 = vand.u32 (!%p372_p10), 127, %v468_v0  ;;  %s1518_s25 = smov (!%p372_p10), 0  }
  0x14   : > { %s1516_s17 = scalar_lea.vmem (!%p372_p10), [#allocation3], %s1126_s28 }
  0x19   : > { %s432_s29 = scalar_select %p431_p11, %s1354_s16, 1 }
  0x1b   : > { %s1151_s30 = sshll.u32 %s432_s29, 4  ;;  %s1129_s11 = sshll.u32 %s432_s29, 3 }
  0x1c   : > { %s1494_s20 = scalar_lea.vmem %s1648_s0, %s1151_s30  ;;  %s443_s21 = scalar_lea.vmem %s1649_s1, %s1129_s11 }
  0x1d   : > { %s1502_s15 = scalar_lea.vmem %s1650_s2, %s1151_s30  ;;  %s1507_s13 = scalar_lea.vmem %s1651_s3, %s1129_s11  ;;  %v1509_v2 = vld [vmem:[%s443_s21] sm:$0xff] }
  0x1e   : > { %v459_v3 = vmul.f32 %v1509_v2, %v1509_v2 }
  0x20   : > { %v461_v4 = vsel %vm460_vm0, %v459_v3, 0.0 }
  0x21   : > { %v462_v5 = vrot.slane %v461_v4, 4 }
  0x23   : > { %v463_v6 = vadd.f32 %v462_v5, %v461_v4 }
  0x25   : > { %v464_v7 = vrot.slane %v463_v6, 2 }
  0x27   : > { %v465_v8 = vadd.f32 %v464_v7, %v463_v6 }
  0x29   : > { %v466_v9 = vrot.slane %v465_v8, 1 }
  0x2b   : > { %v1514_v10 = vadd.f32 %v466_v9, %v465_v8 }
  0x2c LB: >> { %v1368_v11 = vmov 0.0   ;;  %vm1369_vm1 = vmmov 0   ;;  %s1133_s21 = sshll.u32 %s1366_s25, 3  ;;  %s475_s25 = sadd.s32 1, %s1366_s25   ;;  %s1366_s25 = sphi %s1518_s25, %s475_s25  }
  0x2d   : >> { %1166 = vmatprep.subr.mxu0 %v1368_v11  ;;  %1168 = vmatprep.mubr.msk.f32.mxu0 %vm1369_vm1, %v1368_v11  ;;  %s477_s26 = scalar_lea.vmem %s1494_s20, %s1133_s21  ;;  %s659_s27 = scalar_lea.vmem [#allocation2], %s1133_s21 }
  0x2e   : >> { %1167 = vmatpush3.msra.mxu0 %v1509_v2  ;;  %v478_v12 = vld [vmem:[%s477_s26] sm:$0xff]  ;;  %p472_p12 = scmp.ge.s32.totalorder %s475_s25, 2  }
  0x2f   : >> { %1169 = vmatmul.mubr.msk.f32.vlgmr.msra.gmra.mrb[0].mxu0 %vm460_vm0, %v478_v12  ;;  %v479_v13 = vmul.f32 %v478_v12, %v478_v12  ;;  %vm674_vm11 = vcmask (%p472_p12), 1043456   ;;  %vm667_vm12 = vcmask (%p472_p12), 31744   ;;  %vm856_vm13 = vcmask (%p472_p12), 261120   ;;  %v854_v2 = vld [vmem:[%s1655_s7] sm:$0xff] (%p472_p12)  ;;  %s1153_s11 = sshll.u32 (%p472_p12), %s1354_s16, 8  ;;  %s1673_s20 = sand.u32 (%p472_p12), 1, %s1346_s14  }
  0x30   : > { %1185 = vmatprep.mubr.msk.f32.mxu1 (%p472_p12), %vm856_vm13, %v854_v2  ;;  %vm1189_vm14 = vmpackc.low (%p472_p12), %vm856_vm13, %vm856_vm13  ;;  %vm974_vm15 = vcmask (%p472_p12), 130048   ;;  %s1594_s19 = scalar_lea.hbm (%p472_p12), %s1658_s10, %s1153_s11  ;;  %s1602_s16 = scalar_lea.sflag (%p472_p12), [#allocation4], %s1673_s20 }
  0x31   : >> { %v480_v14 = vsel %vm460_vm0, %v479_v13, 0.0  ;;  %s1371_s24 = smov (%p472_p12), [#allocation3]  }
  0x32   : >> { %481 = vadd.xlane.f32.xlu0 %v480_v14  ;;  %s1284_s25 = sshll.u32 (%p472_p12), %s1371_s24, 4  ;;  %s1285_s25 = int_to_ptr.vmem [resolvable:$false] %s1284_s25 }
  0x33   : > { %s1286_s21 = scalar_lea.vmem (%p472_p12), %s1285_s25, 512 }
  0xbf   : >> { %v482_v15 = vpop.xlane.xlu0 %481 }
  0xc0   : >> { %v556_v16 = vadd.f32 %v482_v15, %v1514_v10  ;;  %v944_v10 = vld [vmem:[%s1656_s8] sm:$0xff] (%p472_p12) }
 0x102   : >> { %v552_v17 = vpop.f32.mrb[0].mxu0 }
 0x103   : >> { %v557_v18 = vmul.f32 2.0, %v552_v17  ;;  %v1170_v19 = vpop.f32.mrb[1].mxu0 }
 0x105   : >> { %v558_v20 = vsub.f32 %v556_v16, %v557_v18 }
 0x107   : >> { %v559_v21 = vmax.f32 %v558_v20, 0.0 }
 0x109   : >> { %v560_v22 = vsel %vm460_vm0, %v559_v21, inf }
 0x10a   : >> { %561 = vmin.xlane.f32.xlu0 %v560_v22 }
 0x197   : >> { %v562_v23 = vpop.xlane.xlu0 %561 }
 0x198   : >> { %vm563_vm2 = vcmp.eq.f32.partialorder %v559_v21, %v562_v23  ;;  %v581_v48 = vmax.f32 %v562_v23, 0.0 }
 0x199   : >> { %v564_v24 = vsel %vm563_vm2, %v1488_v1, 8 }
 0x19a   : >> { %v565_v25 = vsel %vm460_vm0, %v564_v24, 2147483647  ;;  %v582_v50 = vmin.f32 %v581_v48, 1e-10 }
 0x19b   : >> { %v567_v26 = vshra.s32 %v565_v25, 16  ;;  %v566_v28 = vand.u32 65535, %v565_v25 }
 0x19c   : >> { %v587_v52 = vmax.f32 %v582_v50, 1e-30  ;;  %v583_v16 = vadd.f32 1e-10, %v582_v50 }
 0x19d   : >> { %v569_v27 = vcvt.s32.f32 %v567_v26  ;;  %v568_v30 = vcvt.s32.f32 %v566_v28 }
 0x19e   : >> { %1264 = vrcp.f32 %v587_v52 }
 0x19f   : >> { %570 = vmin.xlane.f32.xlu1 %v569_v27 }
 0x1a8   : >> { %v1265_v59 = vpop.eup %1264 }
 0x22c   : >> { %v571_v29 = vpop.xlane.xlu1 %570 }
 0x22d   : >> { %vm572_vm3 = vcmp.eq.f32.partialorder %v569_v27, %v571_v29  ;;  %v577_v32 = vcvt.f32.s32 %v571_v29 }
 0x22e   : >> { %v573_v31 = vsel %vm572_vm3, %v568_v30, inf }
 0x22f   : >> { %574 = vmin.xlane.f32.xlu1 %v573_v31  ;;  %v578_v34 = vshll.u32 %v577_v32, 16 }
 0x2bc   : >> { %v575_v33 = vpop.xlane.xlu1 %574 }
 0x2bd   : >> { %v576_v35 = vcvt.f32.s32 %v575_v33 }
 0x2bf   : >> { %v579_v36 = vadd.s32 %v578_v34, %v576_v35  ;;  %v666_v34 = vld [vmem:[%s1652_s4] sm:$0xf] (%p472_p12) }
 0x2c0   : > { %v664_v35 = vld [vmem:[%s1502_s15] sm:$0xff] (%p472_p12)  ;;  %1171 = vmatprep.subr.msk.mxu0 (%p472_p12), %vm674_vm11, %v666_v34 }
 0x2c1   : >> { %vm580_vm4 = vcmp.eq.s32.totalorder %v1488_v1, %v579_v36  ;;  %v665_v36 = vld [vmem:[%s1502_s15 + $0x8] sm:$0xff] (%p472_p12)  ;;  %1173 = vmatprep.mubr.msk.f32.mxu0 (%p472_p12), %vm667_vm12, %v664_v35  ;;  %1172 = vmatpush3.msk.msra.mxu0 (%p472_p12), %vm674_vm11, %v666_v34  ;;  %s992_s15 = sshll.u32 (%p472_p12), %s1516_s17, 4  ;;  %s1596_s15 = int_to_ptr.vmem [resolvable:$true] %s992_s15 }
 0x2c2   : >> { %v591_v37 = vsel %vm580_vm4, 1e+30, %v559_v21  ;;  %v590_v61 = vsel %vm580_vm4, %v1265_v59, 0.0  ;;  %1174 = vmatmul.mubr.msk.f32.vlgmr.msra.gmra.mrb[0].mxu0 (%p472_p12), %vm667_vm12, %v665_v36  ;;  %s1280_s22 = scalar_lea.vmem (%p472_p12), %s1596_s15, 256  ;;  %p1287_p2 = scmp.lt.s32.totalorder (%p472_p12), %s1596_s15, %s1285_s25 }
 0x2c3   : >> { %v592_v38 = vsel %vm460_vm0, %v591_v37, inf  ;;  %p1281_p13 = scmp.ne.s32.totalorder (%p472_p12), %s1596_s15, %s1280_s22  ;;  %p1288_p3 = scmp.lt.s32.totalorder (%p472_p12), %s1286_s21, %s1280_s22 }
 0x2c4   : >> { %593 = vmin.xlane.f32.xlu0 %v592_v38 }
 0x2c5   : > { %p1282_p0 = pnand (%p472_p12), %p1281_p13, %p1469_p4  ;;  %p1289_p5 = por (%p472_p12), %p1288_p3, %p1287_p2 }
 0x2c7   : > { %p1283_p1 = pneg (%p472_p12), %p1282_p0 }
 0x2c9   : > { %p1290_p6 = pnand (%p472_p12), %p1289_p5, %p1283_p1 }
 0x351   : >> { %v594_v39 = vpop.xlane.xlu0 %593 }
 0x352   : >> { %vm595_vm5 = vcmp.eq.f32.partialorder %v591_v37, %v594_v39  ;;  %v613_v49 = vmax.f32 %v594_v39, 0.0  ;;  %v958_v39 = vld [vmem:[%s1657_s9] sm:$0xff] (%p472_p12) }
 0x353   : >> { %v596_v40 = vsel %vm595_vm5, %v1488_v1, 8 }
 0x354   : >> { %v597_v41 = vsel %vm460_vm0, %v596_v40, 2147483647  ;;  %v614_v51 = vmin.f32 %v613_v49, 1e-10  ;;  %v1370_v40 = vmov (%p472_p12), 0  }
 0x355   : >> { %v599_v42 = vshra.s32 %v597_v41, 16  ;;  %v598_v44 = vand.u32 65535, %v597_v41  ;;  %1278 = vset.pattern.permute.xlu0 (%p472_p12), %v1370_v40  ;;  %1279 = vset.pattern.permute.xlu1 (%p472_p12), %v1370_v40  ;;  %v945_v41 = vld [vmem:[%s1656_s8 + $0x8] sm:$0xff] (%p472_p12) }
 0x356   : >> { %v619_v53 = vmax.f32 %v614_v51, 1e-30  ;;  %v615_v15 = vadd.f32 1e-10, %v614_v51 }
 0x357   : >> { %v601_v43 = vcvt.s32.f32 %v599_v42  ;;  %v600_v46 = vcvt.s32.f32 %v598_v44  ;;  %v959_v42 = vld [vmem:[%s1657_s9 + $0x8] sm:$0xff] (%p472_p12) }
 0x358   : >> { %1266 = vrcp.f32 %v619_v53 }
 0x359   : >> { %602 = vmin.xlane.f32.xlu1 %v601_v43  ;;  %1268 = vrcp.f32 %v615_v15 }
 0x35a   : >> { %1270 = vrcp.f32 %v583_v16 }
 0x362   : >> { %v1267_v60 = vpop.eup %1266 }
 0x363   : >> { %v1269_v18 = vpop.eup %1268 }
 0x364   : >> { %v1271_v19 = vpop.eup %1270 }
 0x365   : >> { %v618_v21 = vadd.f32 %v1271_v19, %v1269_v18 }
 0x3e6   : >> { %v603_v45 = vpop.xlane.xlu1 %602 }
 0x3e7   : >> { %vm604_vm6 = vcmp.eq.f32.partialorder %v601_v43, %v603_v45  ;;  %v609_v54 = vcvt.f32.s32 %v603_v45  ;;  %v1140_v43 = vld [vmem:[%s1653_s5] ss:$0 sm:$0xff] (%p472_p12) }
 0x3e8   : >> { %v605_v47 = vsel %vm604_vm6, %v600_v46, inf  ;;  %v1141_v45 = vld [vmem:[%s1654_s6] ss:$0 sm:$0xff] (%p472_p12) }
 0x3e9   : >> { %606 = vmin.xlane.f32.xlu0 %v605_v47  ;;  %v610_v56 = vshll.u32 %v609_v54, 16  ;;  %v855_v54 = vld [vmem:[%s1655_s7 + $0x8] sm:$0xff] (%p472_p12) }
 0x476   : >> { %v607_v55 = vpop.xlane.xlu0 %606 }
 0x477   : >> { %v608_v57 = vcvt.f32.s32 %v607_v55 }
 0x479   : >> { %v611_v58 = vadd.s32 %v610_v56, %v608_v57 }
 0x47b   : >> { %vm612_vm7 = vcmp.eq.s32.totalorder %v1488_v1, %v611_v58 }
 0x47c   : >> { %v623_v62 = vsel %vm612_vm7, 1e+30, %v591_v37  ;;  %v622_v63 = vsel %vm612_vm7, %v1267_v60, %v590_v61  ;;  %v663_v37 = vld [vmem:[%s1507_s13] sm:$0xff] (%p472_p12) }
 0x47d   : >> { %v624_v0 = vsel %vm460_vm0, %v623_v62, inf  ;;  %1176 = vmatprep.subr.mxu0 (%p472_p12), %v663_v37 }
 0x47e   : >> { %625 = vmin.xlane.f32.xlu1 %v624_v0  ;;  %1177 = vmatpush3.msra.mxu0 (%p472_p12), %v663_v37 }
 0x50b   : >> { %v626_v3 = vpop.xlane.xlu1 %625 }
 0x50c   : >> { %vm627_vm8 = vcmp.eq.f32.partialorder %v623_v62, %v626_v3  ;;  %v645_v13 = vmax.f32 %v626_v3, 0.0 }
 0x50d   : >> { %v628_v4 = vsel %vm627_vm8, %v1488_v1, 8 }
 0x50e   : >> { %v629_v5 = vsel %vm460_vm0, %v628_v4, 2147483647  ;;  %v646_v14 = vmin.f32 %v645_v13, 1e-10 }
 0x50f   : >> { %v631_v6 = vshra.s32 %v629_v5, 16  ;;  %v630_v8 = vand.u32 65535, %v629_v5 }
 0x510   : >> { %v647_v17 = vadd.f32 1e-10, %v646_v14  ;;  %v651_v23 = vmax.f32 %v646_v14, 1e-30 }
 0x511   : >> { %v633_v7 = vcvt.s32.f32 %v631_v6  ;;  %v632_v11 = vcvt.s32.f32 %v630_v8 }
 0x512   : >> { %1272 = vrcp.f32 %v647_v17 }
 0x513   : >> { %634 = vmin.xlane.f32.xlu0 %v633_v7  ;;  %1274 = vrcp.f32 %v651_v23 }
 0x51c   : >> { %v1273_v20 = vpop.eup %1272 }
 0x51d   : >> { %v650_v22 = vadd.f32 %v1273_v20, %v618_v21  ;;  %v1275_v30 = vpop.eup %1274 }
 0x51f   : >> { %v655_v24 = vadd.f32 1e-10, %v650_v22 }
 0x521   : >> { %1276 = vrcp.f32 %v655_v24 }
 0x529   : > { %948 = vperm.xlu0 (%p472_p12), %1278, %v944_v10  }
 0x52b   : >> { %v1277_v31 = vpop.eup %1276 }
 0x52d   : > { %953 = vperm.xlu0 (%p472_p12), %1278, %v945_v41  }
 0x5a0   : >> { %v635_v9 = vpop.xlane.xlu0 %634 }
 0x5a1   : >> { %vm636_vm9 = vcmp.eq.f32.partialorder %v633_v7, %v635_v9  ;;  %v641_v25 = vcvt.f32.s32 %v635_v9 }
 0x5a2   : >> { %v637_v12 = vsel %vm636_vm9, %v632_v11, inf }
 0x5a3   : >> { %638 = vmin.xlane.f32.xlu1 %v637_v12  ;;  %v642_v27 = vshll.u32 %v641_v25, 16 }
 0x5a8   : > { %v949_v55 = vpop.permute.xlu0 (%p472_p12), %948 }
 0x5ac   : > { %v954_v57 = vpop.permute.xlu0 (%p472_p12), %953 }
 0x5b4   : > { %962 = vperm.xlu1 (%p472_p12), %1279, %v958_v39  }
 0x5b8   : > { %967 = vperm.xlu1 (%p472_p12), %1279, %v959_v42  }
 0x630   : >> { %v639_v26 = vpop.xlane.xlu1 %638 }
 0x631   : >> { %v640_v28 = vcvt.f32.s32 %v639_v26 }
 0x633   : >> { %v643_v29 = vadd.s32 %v642_v27, %v640_v28  ;;  %474 = sbr.rel (!%p472_p12) target bundleno = 44 (0x2c), region = 113 }
 0x634   : > { %v963_v56 = vpop.permute.xlu1 (%p472_p12), %962 }
 0x635   : >> { %vm644_vm10 = vcmp.eq.s32.totalorder %v1488_v1, %v643_v29 }
 0x636   : >> { %v654_v32 = vsel %vm644_vm10, %v1275_v30, %v622_v63 }
 0x637   : >> { %v658_v33 = vmul.f32 %v1277_v31, %v654_v32 }
 0x638   : > { %v968_v61 = vpop.permute.xlu1 (%p472_p12), %967 }
 0x639   : >> { %660 = vst.msk [vmem:[%s659_s27] sm:$0xff] %vm460_vm0, %v658_v33 }
 0x640   : > { %v661_v38 = vld [vmem:[#allocation2] sm:$0xff]  ;;  %v662_v1 = vld [vmem:[#allocation2 + $0x8] sm:$0xff] }
 0x641   : > { %1178 = vmatprep.mubr.msk.f32.mxu0 %vm460_vm0, %v661_v38 }
 0x642   : > { %1179 = vmatmul.mubr.msk.f32.vlgmr.msra.gmra.mrb[0].mxu0 %vm460_vm0, %v662_v1 }
 0x715   : > { %v1180_v44 = vpop.f32.mrb[0].mxu0 }
 0x716   : > { %v842_v46 = vmul.f32 %v1180_v44, %v1140_v43  ;;  %v825_v47 = vpop.f32.mrb[1].mxu0 }
 0x717   : > { %v841_v48 = vmul.f32 %v1140_v43, %v825_v47 }
 0x718   : > { %v851_v49 = vadd.f32 %v1141_v45, %v842_v46 }
 0x719   : > { %v850_v50 = vadd.f32 %v1141_v45, %v841_v48 }
 0x71a   : > { %v853_v51 = vmax.f32 %v851_v49, 0.0 }
 0x71b   : > { %v852_v52 = vmax.f32 %v850_v50, 0.0 }
 0x71d   : > { %v1188_v53 = vpack.c.bf16 %v853_v51, %v852_v52 }
 0x71f   : > { %1190 = vmatprep.subr.msk.bf16.mxu1 %vm1189_vm14, %v1188_v53 }
 0x720   : > { %1193 = vmatpush3.bf16.xpose.msk.msra.mxu1 %vm1189_vm14, %v1188_v53 }
 0x727   : > { %1186 = vmatmul.mubr.msk.f32.vlgmr.msra.gmra.mrb[0].mxu1 %vm856_vm13, %v855_v54 }
 0x7fa   : > { %v1187_v58 = vpop.f32.mrb[0].mxu1 }
 0x7fb   : > { %v957_v59 = vmul.f32 %v1187_v58, %v954_v57  ;;  %v935_v60 = vpop.f32.mrb[1].mxu1 }
 0x7fc   : > { %v956_v62 = vmul.f32 %v949_v55, %v935_v60 }
 0x7fd   : > { %v971_v63 = vadd.f32 %v968_v61, %v957_v59 }
 0x7fe   : > { %v970_v0 = vadd.f32 %v963_v56, %v956_v62 }
 0x7ff   : > { %v973_v3 = vmax.f32 %v971_v63, 0.0 }
 0x800   : > { %v972_v4 = vmax.f32 %v970_v0, 0.0 }
 0x801   : > { %976 = vst.msk [vmem:[%s1516_s17 + $0x8] sm:$0xff] %vm974_vm15, %v973_v3 }
 0x802   : > { %975 = vst.msk [vmem:[%s1516_s17] sm:$0xff] %vm974_vm15, %v972_v4 }
 0x803   : > { %1293 = shalt.err (!%p1290_p6)
}
 0x804   : > { %s1294_s17 = scalar_lea.hbm %s1594_s19, 256  ;;  %s1298_s28 = scalar_lea.hbm %s1658_s10, 512 }
 0x805   : > { %p1295_p7 = scmp.ne.s32.totalorder %s1594_s19, %s1294_s17  ;;  %p1299_p11 = scmp.lt.u32.totalorder %s1594_s19, %s1658_s10 }
 0x806   : > { %p1300_p12 = scmp.lt.u32.totalorder %s1298_s28, %s1294_s17  ;;  %p1302_p0 = scmp.lt.u32.totalorder %s1294_s17, %s1594_s19 }
 0x807   : > { %p1296_p9 = pnand %p1295_p7, %p1469_p4 }
 0x808   : > { %p1301_p13 = por %p1300_p12, %p1299_p11 }
 0x809   : > { %p1297_p10 = pneg %p1296_p9 }
 0x80a   : > { %p1303_p1 = por %p1302_p0, %p1301_p13 }
 0x80c   : > { %p1304_p2 = pnand %p1303_p1, %p1297_p10 }
 0x80e   : > { %1307 = shalt.err (!%p1304_p2)
}
 0x80f   : > { %s1372_s11 = smov 128   ;;  %s1373_s12 = smov 8  }
 0x810   : > { %1196 = dma.vmem_to_hbm [thread:$0]  (%p1469_p4), %s1596_s15, 256, %s1594_s19, %s1602_s16, %s1372_s11, %s1372_s11, %s1373_s12  }
 0x811 PF: > { %s1674_s13 = sld [smem:[#allocation6_spill]]  ;;  %p1202_p3 = scmp.ge.s32.totalorder %s1362_s18, 2 }
 0x813   : > { %p1199_p5 = pnand %p1202_p3, %p1476_p8 }
 0x817   : > { %s1007_s22 = sand.u32 1, %s1674_s13  }
 0x818   : > { %s1008_s24 = scalar_lea.sflag [#allocation4], %s1007_s22 }
 0x819   : > { %1337 = dma.done.wait (!%p1199_p5), %s1008_s24, 256  }
 0x81a   : > { %1339 = vsyncadd (!%p1199_p5), %s1008_s24, 4294967040  ;;  %s23_s18 = sadd.s32 1, %s1362_s18   ;;  %s1676_s25 = sld [smem:[#allocation7_spill]] }
 0x81b   : > { %p20_p6 = scmp.ge.s32.totalorder %s23_s18, 4   ;;  %s1677_s15 = sld [smem:[#allocation11_spill]] }
 0x81c   : > { %s1678_s16 = sld [smem:[#allocation8_spill]]  ;;  %s1679_s17 = sld [smem:[#allocation9_spill]] }
 0x81d   : > { %s1680_s13 = smov %s1346_s14  ;;  %22 = sbr.rel (!%p20_p6) target bundleno = 4 (0x4), region = 124 }
 0x820   : > { %s1681_s14 = smov %s1676_s25 }
 0x824   :  { %1013 = vsyncpa [#allocation4], 1 }
 0x825   :  { %1015 = vsyncpa [#allocation4 + $0x1], 1 }

</bundles_post_ra>
